<compile_context>
chip_gen: v5e
topology: v5e:2x2
jax: 0.10.0
libtpu: 0.0.40
codegen_flags: <defaults>
</compile_context>

<pallas_src>
import functools

import numpy as np

import jax
import jax.numpy as jnp
from jax import lax
from jax.experimental import pallas as pl
from jax.experimental.pallas import tpu as pltpu


# --------------------------------------------------------------------- host-side 1-D weights
def _cubic_weight(t, a=-0.75):
    """PyTorch bicubic (cubic convolution) kernel, A = -0.75."""
    t = abs(float(t))
    if t <= 1.0:
        return ((a + 2.0) * t - (a + 3.0)) * t * t + 1.0
    if t < 2.0:
        return (((t - 5.0) * t + 8.0) * t - 4.0) * a
    return 0.0


@functools.lru_cache(maxsize=None)
def _interp_matrix_1d(in_size, out_size, mode="bicubic", align_corners=False):
    """U (out_size, in_size) with y = U @ x, matching F.interpolate's 1-D kernel."""
    U = np.zeros((out_size, in_size), dtype=np.float32)
    if in_size == 1:
        U[:, 0] = 1.0
        return U
    if align_corners:
        scale = (in_size - 1) / max(out_size - 1, 1)
        src = np.arange(out_size, dtype=np.float64) * scale
    else:
        scale = in_size / out_size
        src = (np.arange(out_size, dtype=np.float64) + 0.5) * scale - 0.5

    if mode == "bicubic":
        for o, s in enumerate(src):
            f = int(np.floor(s))
            t = s - f
            for k in range(-1, 3):                      # taps at f-1, f, f+1, f+2
                idx = min(max(f + k, 0), in_size - 1)   # border-clamped (PyTorch)
                U[o, idx] += _cubic_weight(t - k)
    elif mode == "bilinear":
        for o, s in enumerate(src):
            s = max(s, 0.0)                             # PyTorch clamps negative src
            f = int(np.floor(s))
            t = s - f
            i0 = min(f, in_size - 1)
            i1 = min(f + 1, in_size - 1)
            U[o, i0] += 1.0 - t
            U[o, i1] += t
    else:
        # TODO(synk): 'nearest' / 'area' modes not implemented (module default is 'bicubic').
        raise NotImplementedError(f"mode={mode}")
    return U


# --------------------------------------------------------------------- Pallas kernel
def _upsample_kernel(x_ref, uh_ref, uwT_ref, o_ref):
    """Separable resize of a tile of G channel maps; intermediate stays in VMEM."""
    G, H, W = x_ref.shape
    _, OH, OW = o_ref.shape
    x = x_ref[...].astype(jnp.float32)
    uh = uh_ref[...]                                     # (OH, H)
    uwT = uwT_ref[...]                                   # (W, OW)

    # Pass 1 (height): batched matmul over the G maps, contracting H.
    uh_b = jnp.broadcast_to(uh[None, :, :], (G, OH, H))
    t = lax.dot_general(uh_b, x,
                        dimension_numbers=(((2,), (1,)), ((0,), (0,))),
                        preferred_element_type=jnp.float32)          # (G, OH, W)

    # Pass 2 (width): one flat MXU matmul with M = G*OH rows (good occupancy).
    y = jnp.dot(t.reshape(G * OH, W), uwT,
                preferred_element_type=jnp.float32)                  # (G*OH, OW)
    o_ref[...] = y.reshape(G, OH, OW).astype(o_ref.dtype)


def _pick_bc_tile(BC, H, W, OH, OW, budget_bytes=8 << 20):
    """Largest divisor of B*C that (a) keeps per-step VMEM (double-buffered x /
    out blocks + in-kernel temporaries) under ~budget_bytes and (b) leaves >= 4
    grid steps for pipelining / megacore sharding whenever B*C allows."""
    per_map = 4 * (2 * H * W + 2 * OH * OW + OH * W + OH * H + OH * OW)
    g_budget = max(1, budget_bytes // per_map)
    divisors = [d for d in range(1, BC + 1) if BC % d == 0 and d <= g_budget]
    if not divisors:
        return 1
    pipelined = [d for d in divisors if BC // d >= 4]
    return max(pipelined) if pipelined else max(divisors)


def _resize_separable(x3, uh, uwT, OH, OW):
    BC, H, W = x3.shape
    G = _pick_bc_tile(BC, H, W, OH, OW)
    grid = (BC // G,)
    flops = 2 * BC * OH * H * W + 2 * BC * OH * W * OW
    bytes_accessed = 4 * (BC * H * W + BC * OH * OW + OH * H + W * OW)
    return pl.pallas_call(
        _upsample_kernel,
        out_shape=jax.ShapeDtypeStruct((BC, OH, OW), x3.dtype),
        grid=grid,
        in_specs=[pl.BlockSpec((G, H, W), lambda i: (i, 0, 0)),
                  pl.BlockSpec((OH, H), lambda i: (0, 0)),    # resident across grid
                  pl.BlockSpec((W, OW), lambda i: (0, 0))],   # resident across grid
        out_specs=pl.BlockSpec((G, OH, OW), lambda i: (i, 0, 0)),
        compiler_params=pltpu.CompilerParams(
            dimension_semantics=("parallel",),
            vmem_limit_bytes=32 * 1024 * 1024),
        cost_estimate=pl.CostEstimate(flops=flops,
                                      transcendentals=0,
                                      bytes_accessed=bytes_accessed),
    )(x3, uh, uwT)


# --------------------------------------------------------------------- module wrapper
def upsample_layer(x_nchw, mode="bicubic", size=None, factor=2, align_corners=False):
    """Pallas equivalent of UpSampleLayer.forward (NCHW in, NCHW out)."""
    B, C, H, W = x_nchw.shape
    if size is not None:
        size = tuple(size) if isinstance(size, (tuple, list)) else (int(size), int(size))
        if (H, W) == size:                   # identity fast-path (matches module)
            return x_nchw
        OH, OW = size
    else:
        if factor == 1:                      # identity fast-path (matches module)
            return x_nchw
        OH, OW = int(H * factor), int(W * factor)

    uh = jnp.asarray(_interp_matrix_1d(H, OH, mode, bool(align_corners)))            # (OH, H)
    uwT = jnp.asarray(np.ascontiguousarray(
        _interp_matrix_1d(W, OW, mode, bool(align_corners)).T))                      # (W, OW)
    x3 = x_nchw.reshape(B * C, H, W)         # contiguous reshape, no transpose
    y3 = _resize_separable(x3, uh, uwT, OH, OW)
    return y3.reshape(B, C, OH, OW)          # contiguous reshape, no transpose


# --------------------------------------------------------------------------------------- main
if __name__ == "__main__":
    key = jax.random.PRNGKey(0)
    B, C, H, W = 2, 4, 16, 16
    x = jax.random.normal(key, (B, C, H, W), jnp.float32)

    # UpSampleLayer defaults: mode='bicubic', factor=2, align_corners=False
    y = upsample_layer(x, mode="bicubic", factor=2, align_corners=False)
    jax.block_until_ready(y)
    assert y.shape == (B, C, 2 * H, 2 * W)
    assert bool(jnp.all(jnp.isfinite(y)))

    # Cross-check the fused separable kernel against a pure-JAX reference.
    Uh = jnp.asarray(_interp_matrix_1d(H, 2 * H, "bicubic", False))
    Uw = jnp.asarray(_interp_matrix_1d(W, 2 * W, "bicubic", False))
    ref = jnp.einsum("ph,qw,bchw->bcpq", Uh, Uw, x, precision=lax.Precision.HIGHEST)
    assert bool(jnp.allclose(y, ref, atol=1e-3, rtol=1e-3))

    # Interpolating a constant field must stay constant (weights sum to 1 per output pixel).
    ones = jnp.ones((1, 1, H, W), jnp.float32)
    y_ones = upsample_layer(ones, factor=2)
    jax.block_until_ready(y_ones)
    assert bool(jnp.allclose(y_ones, 1.0, atol=1e-5))

    # Identity fast-paths.
    assert upsample_layer(x, factor=1) is x
    assert upsample_layer(x, size=(H, W)) is x

    print("KERNEL_OK")
</pallas_src>

<mosaic_0001>
module attributes {stable_mosaic.version = 11 : i64} {
  func.func @_upsample_kernel(%arg0: i32, %arg1: memref<2x16x16xf32, #tpu.memory_space<vmem>>, %arg2: memref<32x16xf32, #tpu.memory_space<vmem>>, %arg3: memref<16x32xf32, #tpu.memory_space<vmem>>, %arg4: memref<2x32x32xf32, #tpu.memory_space<vmem>>) attributes {dimension_semantics = [#tpu.dimension_semantics<parallel>], iteration_bounds = array<i64: 4>, scalar_prefetch = 0 : i64, scratch_operands = 0 : i64, tpu.core_type = #tpu.core_type<tc>, window_params = [{transform_indices = @transform_0, window_bounds = array<i64: 2, 16, 16>}, {pipeline_mode = #tpu.pipeline_mode<synchronous>, transform_indices = @transform_1, window_bounds = array<i64: 32, 16>}, {pipeline_mode = #tpu.pipeline_mode<synchronous>, transform_indices = @transform_2, window_bounds = array<i64: 16, 32>}, {transform_indices = @transform_3, window_bounds = array<i64: 2, 32, 32>}]} {
    %c0 = arith.constant 0 : index
    %c0_0 = arith.constant 0 : index
    %c0_1 = arith.constant 0 : index
    %0 = vector.load %arg1[%c0, %c0_0, %c0_1] : memref<2x16x16xf32, #tpu.memory_space<vmem>>, vector<2x16x16xf32>
    %c0_2 = arith.constant 0 : index
    %c0_3 = arith.constant 0 : index
    %1 = vector.load %arg2[%c0_2, %c0_3] : memref<32x16xf32, #tpu.memory_space<vmem>>, vector<32x16xf32>
    %c0_4 = arith.constant 0 : index
    %c0_5 = arith.constant 0 : index
    %2 = vector.load %arg3[%c0_4, %c0_5] : memref<16x32xf32, #tpu.memory_space<vmem>>, vector<16x32xf32>
    %3 = vector.shape_cast %1 : vector<32x16xf32> to vector<1x32x16xf32>
    %4 = vector.shape_cast %3 : vector<1x32x16xf32> to vector<1x32x16xf32>
    %5 = vector.broadcast %4 : vector<1x32x16xf32> to vector<2x32x16xf32>
    %cst = arith.constant dense<0.000000e+00> : vector<2x32x16xf32>
    %6 = tpu.matmul %5, %0, %cst {dimension_numbers = #tpu.dot_dimension_numbers<[2], [1], [1], [2], [0, 0, 0, 1, 1, 2], [0], [0]>} : vector<2x32x16xf32>, vector<2x16x16xf32>, vector<2x32x16xf32> -> vector<2x32x16xf32>
    %7 = vector.shape_cast %6 : vector<2x32x16xf32> to vector<64x16xf32>
    %cst_6 = arith.constant dense<0.000000e+00> : vector<64x32xf32>
    %8 = tpu.matmul %7, %2, %cst_6 {dimension_numbers = #tpu.dot_dimension_numbers<[1], [0], [0], [1], [0, 0, 1, 1], [], []>} : vector<64x16xf32>, vector<16x32xf32>, vector<64x32xf32> -> vector<64x32xf32>
    %9 = vector.shape_cast %8 : vector<64x32xf32> to vector<2x32x32xf32>
    %c0_7 = arith.constant 0 : index
    %c0_8 = arith.constant 0 : index
    %c0_9 = arith.constant 0 : index
    %10 = vector.load %arg4[%c0_7, %c0_8, %c0_9] : memref<2x32x32xf32, #tpu.memory_space<vmem>>, vector<2x32x32xf32>
    tpu.vector_store %arg4[%c0_7, %c0_8, %c0_9], %9 {strides = array<i32>} : memref<2x32x32xf32, #tpu.memory_space<vmem>>, vector<2x32x32xf32>,
    return
  }
  func.func @transform_0(%arg0: i32) -> (i32, i32, i32) {
    %c0_i32 = arith.constant 0 : i32
    %c0_i32_0 = arith.constant 0 : i32
    %c0_i32_1 = arith.constant 0 : i32
    return %arg0, %c0_i32, %c0_i32_0 : i32, i32, i32
  }
  func.func @transform_1(%arg0: i32) -> (i32, i32) {
    %c0_i32 = arith.constant 0 : i32
    %c0_i32_0 = arith.constant 0 : i32
    %c0_i32_1 = arith.constant 0 : i32
    return %c0_i32, %c0_i32_0 : i32, i32
  }
  func.func @transform_2(%arg0: i32) -> (i32, i32) {
    %c0_i32 = arith.constant 0 : i32
    %c0_i32_0 = arith.constant 0 : i32
    %c0_i32_1 = arith.constant 0 : i32
    return %c0_i32, %c0_i32_0 : i32, i32
  }
  func.func @transform_3(%arg0: i32) -> (i32, i32, i32) {
    %c0_i32 = arith.constant 0 : i32
    %c0_i32_0 = arith.constant 0 : i32
    %c0_i32_1 = arith.constant 0 : i32
    return %arg0, %c0_i32, %c0_i32_0 : i32, i32, i32
  }
}

</mosaic_0001>

<bundles_post_ra>
// kernel: tpu_custom_call.1
= control target key start
LH: loop header
LB: loop body
LE: loop exit
PB: predicated region body
PF: predicated region fallthrough
CT: control target
= control target key end

     0   :  { %8 = vsyncpa [#allocation3], 0  ;;  %s817_s0 = inlined_call_operand.hbm [shape: f32[8,16,16], index: 0, kind: input, shape index: {}]   ;;  %s818_s1 = inlined_call_operand.vmem [shape: f32[32,16], index: 1, kind: input, shape index: {}]   ;;  %s819_s2 = inlined_call_operand.vmem [shape: f32[16,32], index: 2, kind: input, shape index: {}]   ;;  %s820_s3 = inlined_call_operand.hbm [shape: f32[8,32,32], index: 3, kind: output, shape index: {}]  }
   0x1   :  { %10 = vsyncpa [#allocation3 + $0x1], 0 }
   0x2   :  { %11 = vsyncpa [#allocation4], 0 }
   0x3   :  { %13 = vsyncpa [#allocation4 + $0x1], 0  ;;  %s649_s12 = smov 0   ;;  %s651_s13 = smov 0  }
   0x4   :  { %s653_s14 = smov 0   ;;  %s655_s15 = smov 0  }
   0x5 LB: > { %s670_s16 = sadd.s32 4294967295, %s623_s15   ;;  %s439_s17 = sadd.s32 4294967294, %s623_s15   ;;  %s623_s15 = sphi %s655_s15, %s829_s15   ;;  %s619_s14 = sphi %s653_s14, %s828_s14   ;;  %s615_s13 = sphi %s651_s13, %s827_s13   ;;  %s611_s12 = sphi %s649_s12, %s826_s12  }
   0x6   : > { %s674_s18 = sadd.s32 1, %s623_s15   ;;  %s26_s19 = sadd.s32 1, %s619_s14 }
   0x7   : > { %s23_s20 = ssub.s32 %s623_s15, %s674_s18  ;;  %p33_p0 = scmp.ne.s32.totalorder %s619_s14, %s615_s13 }
   0x8   : > { %p24_p1 = scmp.eq.s32.totalorder %s23_s20, 0  ;;  %p34_p2 = scmp.eq.s32.totalorder %s623_s15, 0 }
   0x9   : > { %p39_p3 = scmp.ne.s32.totalorder %s615_s13, %s611_s12  ;;  %p40_p4 = scmp.eq.s32.totalorder %s670_s16, 0 }
   0xa   : > { %s686_s21 = scalar_select %p24_p1, %s619_s14, %s26_s19  }
   0xb   : > { %p688_p5 = por %p34_p2, %p33_p0  ;;  %p692_p6 = por %p40_p4, %p39_p3 }
   0xc   : > { %p105_p7 = scmp.eq.s32.totalorder %s670_s16, 3  ;;  %p111_p8 = scmp.eq.s32.totalorder %s439_s17, 3 }
   0xd   : > { %p489_p9 = scmp.lt.s32.totalorder %s623_s15, 4  ;;  %s137_s26 = sand.u32 1, %s619_s14  }
   0xe   : > { %p698_p10 = por %p105_p7, %p33_p0  ;;  %p702_p11 = por %p111_p8, %p39_p3 }
   0xf   : > { %s472_s27 = sshll.u32 %s623_s15, 5  ;;  %s442_s28 = sshll.u32 %s137_s26, 5 }
  0x10   : > { %s147_s4 = scalar_lea.hbm %s817_s0, %s472_s27  ;;  %s141_s6 = scalar_lea.vmem [#allocation2], %s442_s28 }
  0x11   : > { %s148_s5 = sshll.u32 %s147_s4, 4  ;;  %s150_s7 = sshll.u32 %s141_s6, 4  ;;  %s149_s5 = int_to_ptr.hbm [resolvable:$true] %s148_s5  ;;  %s151_s7 = int_to_ptr.vmem [resolvable:$true] %s150_s7 }
  0x12   : > { %p713_p12 = pnand %p489_p9, %p688_p5  ;;  %p446_p13 = scmp.ge.s32.totalorder %s623_s15, 1 }
  0x13   : > { %p158_p0 = scmp.lt.s32.totalorder %s623_s15, 5  ;;  %s138_s9 = scalar_lea.sflag [#allocation3], %s137_s26 }
  0x14   : > { %s527_s10 = sshra.s32 %s149_s5, 4  ;;  %p531_p2 = pneg %p713_p12  ;;  %s528_s10 = int_to_ptr.hbm [resolvable:$true] %s527_s10 }
  0x15   : > { %s529_s11 = scalar_lea.hbm %s528_s10, 32  ;;  %s534_s20 = scalar_lea.hbm %s817_s0, 128 }
  0x16   : > { %p530_p1 = scmp.ne.s32.totalorder %s528_s10, %s529_s11  ;;  %p535_p5 = scmp.lt.s32.totalorder %s528_s10, %s817_s0 }
  0x17   : > { %p536_p7 = scmp.lt.s32.totalorder %s534_s20, %s529_s11 }
  0x18   : > { %p532_p3 = pnand %p531_p2, %p530_p1 }
  0x19   : > { %p537_p8 = por %p536_p7, %p535_p5 }
  0x1a   : > { %p533_p4 = pneg %p532_p3 }
  0x1c   : > { %p538_p9 = pnand %p537_p8, %p533_p4 }
  0x1e   : > { %541 = shalt.err (!%p538_p9)
}
  0x1f   : > { %s625_s26 = smov 128   ;;  %s626_s28 = smov 8  }
  0x20   : > { %484 = dma.hbm_to_vmem [thread:$0]  (!%p713_p12), %s149_s5, 512, %s151_s7, %s138_s9, %s625_s26, %s625_s26, %s626_s28  }
  0x21   : > { %p159_p1 = pnand %p446_p13, %p158_p0 }
  0x22   : > { %s734_s29 = sand.u32 (!%p159_p1), 1, %s615_s13  }
  0x23   : > { %162 = sbr.rel (%p159_p1) target bundleno = 332 (0x14c), region = 32  ;;  %s447_s30 = sshll.u32 (!%p159_p1), %s734_s29, 5 }
  0x24   : > { %s165_s4 = scalar_lea.sflag (!%p159_p1), [#allocation3], %s734_s29  ;;  %s168_s6 = scalar_lea.vmem (!%p159_p1), [#allocation2], %s447_s30 }
  0x28   : > { %602 = dma.done.wait (%p692_p6), %s165_s4, 512  }
  0x29   : > { %604 = vsyncadd (%p692_p6), %s165_s4, 4294966784  ;;  %v195_v0 = vld [vmem:[%s168_s6 + $0x8] sm:$0xff]  ;;  %v197_v1 = vld [vmem:[%s168_s6 + $0x18] sm:$0xff]  ;;  %vm204_vm0 = vcmask 130048   ;;  %s448_s26 = sshll.u32 %s734_s29, 6  ;;  %vm340_vm1 = vcmask 261120  }
  0x2a   : > { %v194_v2 = vld [vmem:[%s168_s6] sm:$0xff]  ;;  %231 = vmatpush.msra.mxu0 %v195_v0  ;;  %260 = vmatpush.msra.mxu1 %v197_v1  ;;  %v196_v3 = vld [vmem:[%s168_s6 + $0x10] sm:$0xff]  ;;  %v203_v5 = vld [vmem:[%s819_s2 + $0x8] sm:$0xff]  ;;  %s191_s28 = scalar_lea.vmem [#allocation5], %s448_s26  ;;  %s474_s30 = sshll.u32 %s670_s16, 6 }
  0x2b   : > { %v198_v4 = vld [vmem:[%s818_s1] sm:$0xff]  ;;  %313 = vmatpush.msra.mxu2 %v203_v5  ;;  %475 = vmatpush.msra.mxu3 %v203_v5  ;;  %v199_v6 = vld [vmem:[%s818_s1 + $0x8] sm:$0xff]  ;;  %v200_v7 = vld [vmem:[%s818_s1 + $0x10] sm:$0xff]  ;;  %s362_s5 = scalar_lea.hbm %s820_s3, %s474_s30  ;;  %s363_s7 = sshll.u32 %s191_s28, 4  ;;  %s364_s7 = int_to_ptr.vmem [resolvable:$true] %s363_s7 }
  0x2c   : > { %232 = vmatpush.msra.mxu0 %v194_v2  ;;  %261 = vmatpush.msra.mxu1 %v196_v3  ;;  %v201_v8 = vld [vmem:[%s818_s1 + $0x18] sm:$0xff]  ;;  %v202_v9 = vld [vmem:[%s819_s2] sm:$0xff]  ;;  %s365_s8 = sshll.u32 %s362_s5, 4  ;;  %s350_s16 = scalar_lea.sflag [#allocation4], %s734_s29  ;;  %s366_s8 = int_to_ptr.hbm [resolvable:$true] %s365_s8 }
  0x2d   : > { %449 = vmatmul.msk.f32.vlgmr.msra.gmra.mxu0 %vm204_vm0, %v198_v4  ;;  %453 = vmatmul.msk.f32.vlgmr.msra.gmra.mxu1 %vm204_vm0, %v198_v4  ;;  %s571_s9 = sshra.s32 %s366_s8, 4  ;;  %s577_s17 = scalar_lea.hbm %s820_s3, 256  ;;  %s572_s9 = int_to_ptr.hbm [resolvable:$true] %s571_s9 }
  0x2e   : > { %314 = vmatpush.msra.mxu2 %v202_v9  ;;  %476 = vmatpush.msra.mxu3 %v202_v9  ;;  %s573_s23 = scalar_lea.hbm %s572_s9, 64  ;;  %p578_p0 = scmp.lt.s32.totalorder %s572_s9, %s820_s3 }
  0x2f   : > { %p574_p6 = scmp.ne.s32.totalorder %s572_s9, %s573_s23  ;;  %p579_p2 = scmp.lt.s32.totalorder %s577_s17, %s573_s23 }
  0x31   : > { %p575_p12 = pnand %p574_p6, %p698_p10  ;;  %p580_p3 = por %p579_p2, %p578_p0 }
  0x33   : > { %p576_p13 = pneg %p575_p12 }
  0x35   : > { %450 = vmatmul.msk.f32.gmra.mxu0 %vm204_vm0, %v199_v6  ;;  %454 = vmatmul.msk.f32.gmra.mxu1 %vm204_vm0, %v199_v6  ;;  %p581_p4 = pnand %p580_p3, %p576_p13 }
  0x3d   : > { %451 = vmatmul.msk.f32.gmra.mxu0 %vm204_vm0, %v200_v7  ;;  %455 = vmatmul.msk.f32.gmra.mxu1 %vm204_vm0, %v200_v7 }
  0x45   : > { %452 = vmatmul.msk.f32.gmra.mxu0 %vm204_vm0, %v201_v8  ;;  %456 = vmatmul.msk.f32.gmra.mxu1 %vm204_vm0, %v201_v8 }
  0xaa   : > { %v234_v10 = vpop.f32.mrf.mxu0  ;;  %v263_v11 = vpop.f32.mrf.mxu1 }
  0xab   : > { %457 = vmatmul.msk.f32.vlgmr.msra.gmra.mxu2 %vm204_vm0, %v234_v10  ;;  %461 = vmatmul.msk.f32.vlgmr.msra.gmra.mxu3 %vm204_vm0, %v263_v11 }
  0xb2   : > { %v237_v12 = vpop.f32.mrf.mxu0  ;;  %v266_v13 = vpop.f32.mrf.mxu1 }
  0xb3   : > { %458 = vmatmul.msk.f32.gmra.mxu2 %vm204_vm0, %v237_v12  ;;  %462 = vmatmul.msk.f32.gmra.mxu3 %vm204_vm0, %v266_v13 }
  0xba   : > { %v240_v14 = vpop.f32.mrf.mxu0  ;;  %v269_v15 = vpop.f32.mrf.mxu1 }
  0xbb   : > { %459 = vmatmul.msk.f32.gmra.mxu2 %vm204_vm0, %v240_v14  ;;  %463 = vmatmul.msk.f32.gmra.mxu3 %vm204_vm0, %v269_v15 }
  0xc2   : > { %v243_v16 = vpop.f32.mrf.mxu0  ;;  %v272_v17 = vpop.f32.mrf.mxu1 }
  0xc3   : > { %460 = vmatmul.msk.f32.gmra.mxu2 %vm204_vm0, %v243_v16  ;;  %464 = vmatmul.msk.f32.gmra.mxu3 %vm204_vm0, %v272_v17 }
 0x12e   : > { %v316_v18 = vpop.f32.mrf.mxu2  ;;  %v328_v19 = vpop.f32.mrf.mxu3 }
 0x12f   : > { %341 = vst.msk [vmem:[%s191_s28] sm:$0xff] %vm340_vm1, %v316_v18 }
 0x130   : > { %345 = vst.msk [vmem:[%s191_s28 + $0x20] sm:$0xff] %vm340_vm1, %v328_v19 }
 0x136   : > { %v319_v20 = vpop.f32.mrf.mxu2  ;;  %v331_v21 = vpop.f32.mrf.mxu3 }
 0x137   : > { %342 = vst.msk [vmem:[%s191_s28 + $0x8] sm:$0xff] %vm340_vm1, %v319_v20 }
 0x138   : > { %346 = vst.msk [vmem:[%s191_s28 + $0x28] sm:$0xff] %vm340_vm1, %v331_v21 }
 0x13e   : > { %v322_v22 = vpop.f32.mrf.mxu2  ;;  %v334_v23 = vpop.f32.mrf.mxu3 }
 0x13f   : > { %343 = vst.msk [vmem:[%s191_s28 + $0x10] sm:$0xff] %vm340_vm1, %v322_v22 }
 0x140   : > { %347 = vst.msk [vmem:[%s191_s28 + $0x30] sm:$0xff] %vm340_vm1, %v334_v23 }
 0x146   : > { %v325_v24 = vpop.f32.mrf.mxu2  ;;  %v337_v25 = vpop.f32.mrf.mxu3 }
 0x147   : > { %344 = vst.msk [vmem:[%s191_s28 + $0x18] sm:$0xff] %vm340_vm1, %v325_v24 }
 0x148   : > { %348 = vst.msk [vmem:[%s191_s28 + $0x38] sm:$0xff] %vm340_vm1, %v337_v25 }
 0x149   : > { %584 = shalt.err (!%p581_p4)
}
 0x14a   : > { %s627_s29 = smov 128   ;;  %s628_s22 = smov 8  }
 0x14b   : > { %479 = dma.vmem_to_hbm [thread:$0]  (%p698_p10), %s364_s7, 1024, %s366_s8, %s350_s16, %s627_s29, %s627_s29, %s628_s22  }
 0x14c PF: > { %p490_p5 = scmp.ge.s32.totalorder %s623_s15, 2  ;;  %s380_s27 = sand.u32 1, %s611_s12  }
 0x14d   : > { %s381_s26 = scalar_lea.sflag [#allocation4], %s380_s27 }
 0x14e   : > { %p486_p7 = pnand %p490_p5, %p702_p11 }
 0x150   : > { %p487_p8 = pneg %p486_p7 }
 0x152   : > { %606 = dma.done.wait (%p487_p8), %s381_s26, 1024  }
 0x153   : > { %608 = vsyncadd (%p487_p8), %s381_s26, 4294966272  ;;  %p16_p9 = scmp.ge.s32.totalorder %s674_s18, 6   ;;  %s826_s12 = smov %s615_s13 }
 0x154   : > { %s827_s13 = smov %s619_s14  ;;  %s828_s14 = smov %s686_s21 }
 0x155   : > { %s829_s15 = smov %s674_s18  ;;  %18 = sbr.rel (!%p16_p9) target bundleno = 5 (0x5), region = 77 }
 0x15a   :  { %387 = vsyncpa [#allocation3], 1 }
 0x15b   :  { %389 = vsyncpa [#allocation3 + $0x1], 1 }
 0x15c   :  { %390 = vsyncpa [#allocation4], 1 }
 0x15d   :  { %392 = vsyncpa [#allocation4 + $0x1], 1 }

</bundles_post_ra>
